<compile_context>
chip_gen: v7x
topology: tpu7x:2x2x1
jax: 0.10.0
libtpu: 0.0.40
codegen_flags: <defaults>
</compile_context>

<pallas_src>
import jax
import jax.numpy as jnp
from jax.experimental import pallas as pl
from jax.experimental.pallas import tpu as pltpu

LANE = 128
_VMEM_LIMIT = 32 * 1024 * 1024  # safe on v5e/v6e/v7x


def _round_up(x, m):
    return ((x + m - 1) // m) * m


# ----------------------------------------------------------------------------
# Kernels
# ----------------------------------------------------------------------------
def gcn_layer_kernel(a_ref, h_ref, w_ref, b_ref, out_ref, acc_ref):
    """One GCN layer row tile: out[i] = relu((sum_k A[i,k] @ H[k]) @ W + b).

    Grid = (row_tiles, col_tiles); col axis is the reduction over source nodes.
    A and H arrive in bf16 (MXU native); accumulation + epilogue are f32.
    """
    k = pl.program_id(1)

    @pl.when(k == 0)
    def _init():
        acc_ref[...] = jnp.zeros_like(acc_ref)

    acc_ref[...] += jnp.dot(a_ref[...], h_ref[...],
                            preferred_element_type=jnp.float32)

    @pl.when(k == pl.num_programs(1) - 1)
    def _finalize():
        # Tiny feature transform + bias + ReLU only once per row tile (f32).
        out = jnp.dot(acc_ref[...], w_ref[...],
                      preferred_element_type=jnp.float32) + b_ref[...]
        out_ref[...] = jnp.maximum(out, 0.0).astype(out_ref.dtype)


def sum_readout_kernel(s_ref, h_ref, g_ref, acc_ref):
    """'sum' readout: graph_emb = S @ H2, accumulated over node row tiles."""
    k = pl.program_id(0)

    @pl.when(k == 0)
    def _init():
        acc_ref[...] = jnp.zeros_like(acc_ref)

    acc_ref[...] += jnp.dot(s_ref[...], h_ref[...],
                            preferred_element_type=jnp.float32)

    @pl.when(k == pl.num_programs(0) - 1)
    def _finalize():
        g_ref[...] = acc_ref[...]


# ----------------------------------------------------------------------------
# pallas_call wrappers
# ----------------------------------------------------------------------------
def _gcn_layer(a_pad, h_pad, w_pad, b_pad, *, tile_m, tile_k, out_dtype):
    npad = a_pad.shape[0]
    fpad = h_pad.shape[1]
    hpad = w_pad.shape[1]
    grid = (npad // tile_m, npad // tile_k)

    flops = 2 * npad * npad * fpad + 2 * npad * fpad * hpad
    bytes_accessed = int(
        a_pad.size * a_pad.dtype.itemsize
        + grid[0] * h_pad.size * h_pad.dtype.itemsize
        + w_pad.size * 4 + b_pad.size * 4
        + npad * hpad * jnp.dtype(out_dtype).itemsize)

    return pl.pallas_call(
        gcn_layer_kernel,
        out_shape=jax.ShapeDtypeStruct((npad, hpad), out_dtype),
        grid_spec=pltpu.PrefetchScalarGridSpec(
            num_scalar_prefetch=0,
            grid=grid,
            in_specs=[
                pl.BlockSpec((tile_m, tile_k), lambda i, k: (i, k)),   # A_hat tile
                pl.BlockSpec((tile_k, fpad), lambda i, k: (k, 0)),     # H tile
                pl.BlockSpec((fpad, hpad), lambda i, k: (0, 0)),       # W (resident)
                pl.BlockSpec((1, hpad), lambda i, k: (0, 0)),          # bias
            ],
            out_specs=pl.BlockSpec((tile_m, hpad), lambda i, k: (i, 0)),
            scratch_shapes=[pltpu.VMEM((tile_m, fpad), jnp.float32)],
        ),
        compiler_params=pltpu.CompilerParams(
            dimension_semantics=("parallel", "arbitrary"),
            vmem_limit_bytes=_VMEM_LIMIT,
        ),
        cost_estimate=pl.CostEstimate(flops=flops, transcendentals=0,
                                      bytes_accessed=bytes_accessed),
    )(a_pad, h_pad, w_pad, b_pad)


def _sum_readout(s_pad, h_pad, *, tile_k):
    gpad, npad = s_pad.shape
    hpad = h_pad.shape[1]
    return pl.pallas_call(
        sum_readout_kernel,
        out_shape=jax.ShapeDtypeStruct((gpad, hpad), jnp.float32),
        grid_spec=pltpu.PrefetchScalarGridSpec(
            num_scalar_prefetch=0,
            grid=(npad // tile_k,),
            in_specs=[
                pl.BlockSpec((gpad, tile_k), lambda k: (0, k)),
                pl.BlockSpec((tile_k, hpad), lambda k: (k, 0)),
            ],
            out_specs=pl.BlockSpec((gpad, hpad), lambda k: (0, 0)),
            scratch_shapes=[pltpu.VMEM((gpad, hpad), jnp.float32)],
        ),
        compiler_params=pltpu.CompilerParams(
            dimension_semantics=("arbitrary",),
            vmem_limit_bytes=_VMEM_LIMIT,
        ),
    )(s_pad, h_pad)


# ----------------------------------------------------------------------------
# Glue: normalized adjacency, padding, full forward
# ----------------------------------------------------------------------------
def gcn_normalized_adjacency(edge_index, num_nodes):
    """Dense D^{-1/2}(A + I)D^{-1/2} from a (2, E) edge_index (messages src->dst)."""
    src, dst = edge_index[0], edge_index[1]
    a = jnp.zeros((num_nodes, num_nodes), jnp.float32)
    a = a.at[dst, src].add(1.0)
    a = a + jnp.eye(num_nodes, dtype=jnp.float32)
    deg = jnp.sum(a, axis=1)
    dinv = jnp.where(deg > 0, 1.0 / jnp.sqrt(deg), 0.0)
    return a * dinv[:, None] * dinv[None, :]


def gnn_forward(x, edge_index, batch, params, num_graphs, *, tile=512):
    n, f_in = x.shape
    hid = params["w2"].shape[1]

    npad = _round_up(n, LANE)
    tile_n = min(tile, npad)
    while npad % tile_n != 0:      # largest power-of-two multiple of 128 that divides npad
        tile_n //= 2
    fpad = _round_up(max(f_in, 1), LANE)
    hpad = _round_up(hid, LANE)

    # Dense symmetric-normalized adjacency, bf16, zero-padded.  Padded rows/cols
    # are zero so padded nodes never contaminate real outputs.
    a_hat = gcn_normalized_adjacency(edge_index, n).astype(jnp.bfloat16)
    a_pad = jnp.zeros((npad, npad), jnp.bfloat16).at[:n, :n].set(a_hat)

    x_pad = jnp.zeros((npad, fpad), jnp.bfloat16).at[:n, :f_in].set(x.astype(jnp.bfloat16))
    w1_pad = jnp.zeros((fpad, hpad), jnp.float32).at[:f_in, :hid].set(params["w1"])
    b1_pad = jnp.zeros((1, hpad), jnp.float32).at[:, :hid].set(params["b1"].reshape(1, hid))
    w2_pad = jnp.zeros((hpad, hpad), jnp.float32).at[:hid, :hid].set(params["w2"])
    b2_pad = jnp.zeros((1, hpad), jnp.float32).at[:, :hid].set(params["b2"].reshape(1, hid))

    # Layer 1: relu((A @ X) @ W1 + b1)  (dropout in eval mode is identity).
    # Intermediate kept in bf16 to halve the layer-2 streaming traffic.
    h1_pad = _gcn_layer(a_pad, x_pad, w1_pad, b1_pad,
                        tile_m=tile_n, tile_k=tile_n, out_dtype=jnp.bfloat16)
    # Layer 2: relu((A @ H1) @ W2 + b2)  -> f32, 128-lane-dense node embeddings.
    h2_pad = _gcn_layer(a_pad, h1_pad, w2_pad, b2_pad,
                        tile_m=tile_n, tile_k=tile_n, out_dtype=jnp.float32)

    # 'sum' readout: graph_emb[g] = sum_{i: batch[i]==g} h2[i]  via S @ H2.
    gpad = _round_up(max(num_graphs, 1), 8)
    batch_pad = jnp.full((npad,), -1, jnp.int32).at[:n].set(batch.astype(jnp.int32))
    s_pad = (batch_pad[None, :] ==
             jnp.arange(gpad, dtype=jnp.int32)[:, None]).astype(jnp.float32)
    g_pad = _sum_readout(s_pad, h2_pad, tile_k=tile_n)

    return {
        "node_embedding": h2_pad[:n, :hid],
        "graph_embedding": g_pad[:num_graphs, :hid],
    }


def init_params(key, f_in, hid):
    k1, k2 = jax.random.split(key)
    w1 = jax.random.normal(k1, (f_in, hid), jnp.float32) * (2.0 / (f_in + hid)) ** 0.5
    w2 = jax.random.normal(k2, (hid, hid), jnp.float32) * (2.0 / (hid + hid)) ** 0.5
    b1 = jnp.zeros((1, hid), jnp.float32)
    b2 = jnp.zeros((1, hid), jnp.float32)
    return {"w1": w1, "b1": b1, "w2": w2, "b2": b2}


def _reference_forward(x, edge_index, batch, params, num_graphs):
    a = gcn_normalized_adjacency(edge_index, x.shape[0])
    h1 = jnp.maximum(a @ (x @ params["w1"]) + params["b1"], 0.0)
    h2 = jnp.maximum(a @ (h1 @ params["w2"]) + params["b2"], 0.0)
    g = jax.ops.segment_sum(h2, batch, num_segments=num_graphs)
    return h2, g


if __name__ == "__main__":
    key = jax.random.PRNGKey(0)
    N, F_IN, HID, G, E = 16, 8, 32, 2, 40

    kx, ke, kp = jax.random.split(key, 3)
    x = jax.random.normal(kx, (N, F_IN), jnp.float32)
    edge_index = jax.random.randint(ke, (2, E), 0, N, dtype=jnp.int32)
    batch = jnp.concatenate([jnp.zeros(N // 2, jnp.int32),
                             jnp.ones(N - N // 2, jnp.int32)])  # 2 graphs
    params = init_params(kp, F_IN, HID)

    out = gnn_forward(x, edge_index, batch, params, num_graphs=G)
    jax.block_until_ready(out)

    assert out["node_embedding"].shape == (N, HID)
    assert out["graph_embedding"].shape == (G, HID)

    # Loose correctness check vs. pure-JAX f32 reference (kernel streams bf16).
    ref_node, ref_graph = _reference_forward(x, edge_index, batch, params, G)
    assert jnp.allclose(out["node_embedding"], ref_node, rtol=1e-1, atol=1e-1)
    assert jnp.allclose(out["graph_embedding"], ref_graph, rtol=1e-1, atol=1e-1)

    print("KERNEL_OK")
</pallas_src>

<mosaic_0001>
module attributes {stable_mosaic.version = 11 : i64} {
  func.func @gcn_layer_kernel(%arg0: i32, %arg1: i32, %arg2: memref<128x128xbf16, #tpu.memory_space<vmem>>, %arg3: memref<128x128xbf16, #tpu.memory_space<vmem>>, %arg4: memref<128x128xf32, #tpu.memory_space<vmem>>, %arg5: memref<1x128xf32, #tpu.memory_space<vmem>>, %arg6: memref<128x128xbf16, #tpu.memory_space<vmem>>, %arg7: memref<128x128xf32, #tpu.memory_space<vmem>>) attributes {dimension_semantics = [#tpu.dimension_semantics<parallel>, #tpu.dimension_semantics<arbitrary>], iteration_bounds = array<i64: 1, 1>, scalar_prefetch = 0 : i64, scratch_operands = 1 : i64, tpu.core_type = #tpu.core_type<tc>, window_params = [{transform_indices = @transform_0, window_bounds = array<i64: 128, 128>}, {transform_indices = @transform_1, window_bounds = array<i64: 128, 128>}, {pipeline_mode = #tpu.pipeline_mode<synchronous>, transform_indices = @transform_2, window_bounds = array<i64: 128, 128>}, {pipeline_mode = #tpu.pipeline_mode<synchronous>, transform_indices = @transform_3, window_bounds = array<i64: 1, 128>}, {transform_indices = @transform_4, window_bounds = array<i64: 128, 128>}]} {
    %c0_i32 = arith.constant 0 : i32
    %0 = arith.cmpi eq, %arg1, %c0_i32 : i32
    %1 = arith.extui %0 : i1 to i32
    %c0_i32_0 = arith.constant 0 : i32
    %2 = arith.cmpi ne, %1, %c0_i32_0 : i32
    scf.if %2 {
      %cst_10 = arith.constant 0.000000e+00 : f32
      %12 = vector.broadcast %cst_10 : f32 to vector<128x128xf32>
      %c0_11 = arith.constant 0 : index
      %c0_12 = arith.constant 0 : index
      %13 = vector.load %arg7[%c0_11, %c0_12] : memref<128x128xf32, #tpu.memory_space<vmem>>, vector<128x128xf32>
      tpu.vector_store %arg7[%c0_11, %c0_12], %12 {strides = array<i32>} : memref<128x128xf32, #tpu.memory_space<vmem>>, vector<128x128xf32>,
    } else {
    }
    %c0 = arith.constant 0 : index
    %c0_1 = arith.constant 0 : index
    %3 = vector.load %arg7[%c0, %c0_1] : memref<128x128xf32, #tpu.memory_space<vmem>>, vector<128x128xf32>
    %c0_2 = arith.constant 0 : index
    %c0_3 = arith.constant 0 : index
    %4 = vector.load %arg2[%c0_2, %c0_3] : memref<128x128xbf16, #tpu.memory_space<vmem>>, vector<128x128xbf16>
    %c0_4 = arith.constant 0 : index
    %c0_5 = arith.constant 0 : index
    %5 = vector.load %arg3[%c0_4, %c0_5] : memref<128x128xbf16, #tpu.memory_space<vmem>>, vector<128x128xbf16>
    %cst = arith.constant dense<0.000000e+00> : vector<128x128xf32>
    %6 = tpu.matmul %4, %5, %cst {dimension_numbers = #tpu.dot_dimension_numbers<[1], [0], [0], [1], [0, 0, 1, 1], [], []>} : vector<128x128xbf16>, vector<128x128xbf16>, vector<128x128xf32> -> vector<128x128xf32>
    %7 = arith.addf %3, %6 : vector<128x128xf32>
    %c0_6 = arith.constant 0 : index
    %c0_7 = arith.constant 0 : index
    %8 = vector.load %arg7[%c0_6, %c0_7] : memref<128x128xf32, #tpu.memory_space<vmem>>, vector<128x128xf32>
    tpu.vector_store %arg7[%c0_6, %c0_7], %7 {strides = array<i32>} : memref<128x128xf32, #tpu.memory_space<vmem>>, vector<128x128xf32>,
    %c0_i32_8 = arith.constant 0 : i32
    %9 = arith.cmpi eq, %arg1, %c0_i32_8 : i32
    %10 = arith.extui %9 : i1 to i32
    %c0_i32_9 = arith.constant 0 : i32
    %11 = arith.cmpi ne, %10, %c0_i32_9 : i32
    scf.if %11 {
      %c0_10 = arith.constant 0 : index
      %c0_11 = arith.constant 0 : index
      %12 = vector.load %arg7[%c0_10, %c0_11] : memref<128x128xf32, #tpu.memory_space<vmem>>, vector<128x128xf32>
      %c0_12 = arith.constant 0 : index
      %c0_13 = arith.constant 0 : index
      %13 = vector.load %arg4[%c0_12, %c0_13] : memref<128x128xf32, #tpu.memory_space<vmem>>, vector<128x128xf32>
      %cst_14 = arith.constant dense<0.000000e+00> : vector<128x128xf32>
      %14 = tpu.matmul %12, %13, %cst_14 {dimension_numbers = #tpu.dot_dimension_numbers<[1], [0], [0], [1], [0, 0, 1, 1], [], []>} : vector<128x128xf32>, vector<128x128xf32>, vector<128x128xf32> -> vector<128x128xf32>
      %c0_15 = arith.constant 0 : index
      %c0_16 = arith.constant 0 : index
      %15 = vector.load %arg5[%c0_15, %c0_16] : memref<1x128xf32, #tpu.memory_space<vmem>>, vector<1x128xf32>
      %16 = vector.broadcast %15 : vector<1x128xf32> to vector<128x128xf32>
      %17 = arith.addf %14, %16 : vector<128x128xf32>
      %cst_17 = arith.constant 0.000000e+00 : f32
      %18 = vector.broadcast %cst_17 : f32 to vector<128x128xf32>
      %19 = arith.maximumf %17, %18 : vector<128x128xf32>
      %20 = arith.truncf %19 : vector<128x128xf32> to vector<128x128xbf16>
      %c0_18 = arith.constant 0 : index
      %c0_19 = arith.constant 0 : index
      %21 = vector.load %arg6[%c0_18, %c0_19] : memref<128x128xbf16, #tpu.memory_space<vmem>>, vector<128x128xbf16>
      tpu.vector_store %arg6[%c0_18, %c0_19], %20 {strides = array<i32>} : memref<128x128xbf16, #tpu.memory_space<vmem>>, vector<128x128xbf16>,
    } else {
    }
    return
  }
  func.func @transform_0(%arg0: i32, %arg1: i32) -> (i32, i32) {
    %c0_i32 = arith.constant 0 : i32
    return %arg0, %arg1 : i32, i32
  }
  func.func @transform_1(%arg0: i32, %arg1: i32) -> (i32, i32) {
    %c0_i32 = arith.constant 0 : i32
    %c0_i32_0 = arith.constant 0 : i32
    return %arg1, %c0_i32 : i32, i32
  }
  func.func @transform_2(%arg0: i32, %arg1: i32) -> (i32, i32) {
    %c0_i32 = arith.constant 0 : i32
    %c0_i32_0 = arith.constant 0 : i32
    %c0_i32_1 = arith.constant 0 : i32
    return %c0_i32, %c0_i32_0 : i32, i32
  }
  func.func @transform_3(%arg0: i32, %arg1: i32) -> (i32, i32) {
    %c0_i32 = arith.constant 0 : i32
    %c0_i32_0 = arith.constant 0 : i32
    %c0_i32_1 = arith.constant 0 : i32
    return %c0_i32, %c0_i32_0 : i32, i32
  }
  func.func @transform_4(%arg0: i32, %arg1: i32) -> (i32, i32) {
    %c0_i32 = arith.constant 0 : i32
    %c0_i32_0 = arith.constant 0 : i32
    return %arg0, %c0_i32 : i32, i32
  }
}

</mosaic_0001>

<bundles_post_ra>
// kernel: tpu_custom_call.1
= control target key start
LH: loop header
LB: loop body
LE: loop exit
PB: predicated region body
PF: predicated region fallthrough
CT: control target
= control target key end

     0   :  { %9 = vsyncpa [#allocation4], 0  ;;  %s1136_s0 = inlined_call_operand.hbm [shape: bf16[128,128], index: 0, kind: input, shape index: {}]   ;;  %s1137_s1 = inlined_call_operand.hbm [shape: bf16[128,128], index: 1, kind: input, shape index: {}]   ;;  %s1138_s2 = inlined_call_operand.hbm [shape: f32[128,128], index: 2, kind: input, shape index: {}]   ;;  %s1139_s3 = inlined_call_operand.vmem [shape: f32[1,128], index: 3, kind: input, shape index: {}]   ;;  %s1140_s4 = inlined_call_operand.hbm [shape: bf16[128,128], index: 4, kind: output, shape index: {}]  }
   0x1   :  { %10 = vsyncpa [#allocation7], 0 }
   0x2   :  { %11 = vsyncpa [#allocation5], 0  ;;  %s1036_s15 = smov [#allocation6]   ;;  %s1037_s17 = smov [#allocation3]  }
   0x3   :  { %s29_s16 = sshll.u32 %s1036_s15, 4  ;;  %s17_s18 = sshll.u32 %s1037_s17, 4  ;;  %s30_s16 = int_to_ptr.vmem [resolvable:$true] %s29_s16  ;;  %s1069_s18 = int_to_ptr.vmem [resolvable:$true] %s17_s18 }
   0x4   :  { %s942_s21 = scalar_lea.hbm %s1137_s1, 1024 }
   0x5   :  { %p943_p0 = scmp.ne.s32.totalorder %s1137_s1, %s942_s21  ;;  %p946_p1 = scmp.lt.u32.totalorder %s942_s21, %s1137_s1 }
   0x7   :  { %p948_p2 = pnand %p946_p1, %p943_p0 }
   0x9   :  { %951 = shalt.err (!%p948_p2)
}
   0xa   :  { %s952_s26 = scalar_lea.vmem %s30_s16, 1024  ;;  %p957_p4 = scmp.lt.s32.totalorder %s30_s16, %s30_s16 }
   0xb   :  { %p953_p3 = scmp.ne.s32.totalorder %s30_s16, %s952_s26  ;;  %p958_p5 = scmp.lt.s32.totalorder %s952_s26, %s952_s26 }
   0xd   :  { %p959_p6 = por %p958_p5, %p957_p4 }
   0xf   :  { %p960_p7 = pnand %p959_p6, %p953_p3 }
  0x11   :  { %963 = shalt.err (!%p960_p7)
}
  0x12   :  { %s1038_s27 = smov 64   ;;  %s1039_s28 = smov 4  }
  0x13   :  { %35 = dma.hbm_to_vmem [thread:$0]  %s1137_s1, 1024, %s30_s16, [#allocation7], %s1038_s27, %s1038_s27, %s1039_s28  }
  0x14   :  { %s964_s7 = scalar_lea.hbm %s1136_s0, 1024 }
  0x15   :  { %p965_p8 = scmp.ne.s32.totalorder %s1136_s0, %s964_s7  ;;  %p968_p9 = scmp.lt.u32.totalorder %s964_s7, %s1136_s0 }
  0x17   :  { %p970_p10 = pnand %p968_p9, %p965_p8 }
  0x19   :  { %973 = shalt.err (!%p970_p10)
}
  0x1a   :  { %s974_s12 = scalar_lea.vmem %s1069_s18, 1024  ;;  %p979_p12 = scmp.lt.s32.totalorder %s1069_s18, %s1069_s18 }
  0x1b   :  { %p975_p11 = scmp.ne.s32.totalorder %s1069_s18, %s974_s12  ;;  %p980_p13 = scmp.lt.s32.totalorder %s974_s12, %s974_s12 }
  0x1d   :  { %p981_p0 = por %p980_p13, %p979_p12 }
  0x1f   :  { %p982_p1 = pnand %p981_p0, %p975_p11 }
  0x21   :  { %985 = shalt.err (!%p982_p1)
}
  0x22   :  { %23 = dma.hbm_to_vmem [thread:$0]  %s1136_s0, 1024, %s1069_s18, [#allocation4], %s1038_s27, %s1038_s27, %s1039_s28  }
  0x23   :  { %s1040_s14 = smov [#allocation8]   ;;  %s986_s19 = scalar_lea.hbm %s1138_s2, 2048 }
  0x24   :  { %s41_s15 = sshll.u32 %s1040_s14, 4  ;;  %p987_p2 = scmp.ne.s32.totalorder %s1138_s2, %s986_s19  ;;  %s42_s15 = int_to_ptr.vmem [resolvable:$true] %s41_s15 }
  0x25   :  { %p990_p3 = scmp.lt.u32.totalorder %s986_s19, %s1138_s2 }
  0x27   :  { %p992_p4 = pnand %p990_p3, %p987_p2 }
  0x29   :  { %995 = shalt.err (!%p992_p4)
}
  0x2a   :  { %s996_s24 = scalar_lea.vmem %s42_s15, 2048  ;;  %p1001_p6 = scmp.lt.s32.totalorder %s42_s15, %s42_s15 }
  0x2b   :  { %p997_p5 = scmp.ne.s32.totalorder %s42_s15, %s996_s24  ;;  %p1002_p7 = scmp.lt.s32.totalorder %s996_s24, %s996_s24 }
  0x2d   :  { %p1003_p8 = por %p1002_p7, %p1001_p6 }
  0x2f   :  { %p1004_p9 = pnand %p1003_p8, %p997_p5 }
  0x31   :  { %1007 = shalt.err (!%p1004_p9)
}
  0x32   :  { %s1041_s0 = smov 128   ;;  %s1042_s18 = smov 8  }
  0x33   :  { %47 = dma.hbm_to_vmem [thread:$0]  %s1138_s2, 2048, %s42_s15, [#allocation7], %s1041_s0, %s1041_s0, %s1042_s18  }
  0x34   :  { %1030 = dma.done.wait [#allocation4], 1024  }
  0x35   :  { %1031 = vsyncadd [#allocation4], 4294966272 }
  0x36   :  { %1032 = dma.done.wait [#allocation7], 3072  }
  0x37   :  { %1033 = vsyncadd [#allocation7], 4294964224  ;;  %v926_v0 = vld [vmem:[#allocation6] sm:$0xff]   ;;  %v927_v1 = vld [vmem:[#allocation6 + $0x8] sm:$0xff]  }
  0x38   :  { %798 = vmatprep.subr.bf16.mxu0 %v926_v0  ;;  %v928_v2 = vld [vmem:[#allocation6 + $0x10] sm:$0xff]   ;;  %v929_v3 = vld [vmem:[#allocation6 + $0x18] sm:$0xff]   ;;  %v934_v4 = vld [vmem:[#allocation3] sm:$0xff]  }
  0x39   :  { %799 = vmatpush3.bf16.msra.mxu0 %v926_v0  ;;  %814 = vmatprep.mubr.bf16.mxu0 %v934_v4  ;;  %v930_v5 = vld [vmem:[#allocation6 + $0x20] sm:$0xff]   ;;  %v931_v6 = vld [vmem:[#allocation6 + $0x28] sm:$0xff]   ;;  %v374_v9 = vld [vmem:[#allocation8 + $0x10] sm:$0xff] }
  0x3a   :  { %800 = vmatprep.subr.bf16.mxu0 %v927_v1  ;;  %v372_v7 = vld [vmem:[#allocation8] sm:$0xff]  ;;  %v373_v8 = vld [vmem:[#allocation8 + $0x8] sm:$0xff]  ;;  %v375_v11 = vld [vmem:[#allocation8 + $0x18] sm:$0xff] }
  0x3b   :  { %v886_v10 = vpack.c.bf16 %v373_v8, %v372_v7  ;;  %v890_v12 = vpack.c.bf16 %v375_v11, %v374_v9  ;;  %v376_v13 = vld [vmem:[#allocation8 + $0x20] sm:$0xff]  ;;  %v377_v14 = vld [vmem:[#allocation8 + $0x28] sm:$0xff]  ;;  %v932_v15 = vld [vmem:[#allocation6 + $0x30] sm:$0xff]  }
  0x3c   :  { %v894_v16 = vpack.c.bf16 %v377_v14, %v376_v13  ;;  %v378_v17 = vld [vmem:[#allocation8 + $0x30] sm:$0xff]  ;;  %v379_v18 = vld [vmem:[#allocation8 + $0x38] sm:$0xff]  ;;  %v380_v21 = vld [vmem:[#allocation8 + $0x40] sm:$0xff] }
  0x3d   :  { %801 = vmatpush3.bf16.msra.mxu0 %v927_v1  ;;  %887 = vmatprep.subr.bf16.mxu1 %v886_v10  ;;  %v933_v19 = vld [vmem:[#allocation6 + $0x38] sm:$0xff]   ;;  %v898_v20 = vpack.c.bf16 %v379_v18, %v378_v17  ;;  %v381_v22 = vld [vmem:[#allocation8 + $0x48] sm:$0xff]  ;;  %v382_v25 = vld [vmem:[#allocation8 + $0x50] sm:$0xff] }
  0x3e   :  { %802 = vmatprep.subr.bf16.mxu0 %v928_v2  ;;  %889 = vmatpush3.bf16.msra.mxu1 %v886_v10  ;;  %v902_v23 = vpack.c.bf16 %v381_v22, %v380_v21  ;;  %v935_v24 = vld [vmem:[#allocation3 + $0x8] sm:$0xff]   ;;  %v383_v26 = vld [vmem:[#allocation8 + $0x58] sm:$0xff]  ;;  %v936_v27 = vld [vmem:[#allocation3 + $0x10] sm:$0xff]  }
  0x3f   :  { %891 = vmatprep.subr.bf16.mxu1 %v890_v12  ;;  %v906_v28 = vpack.c.bf16 %v383_v26, %v382_v25  ;;  %v384_v29 = vld [vmem:[#allocation8 + $0x60] sm:$0xff]  ;;  %v385_v30 = vld [vmem:[#allocation8 + $0x68] sm:$0xff]  ;;  %v937_v32 = vld [vmem:[#allocation3 + $0x18] sm:$0xff]  }
  0x40   :  { %v910_v31 = vpack.c.bf16 %v385_v30, %v384_v29  ;;  %v938_v33 = vld [vmem:[#allocation3 + $0x20] sm:$0xff]   ;;  %v939_v34 = vld [vmem:[#allocation3 + $0x28] sm:$0xff]   ;;  %v940_v35 = vld [vmem:[#allocation3 + $0x30] sm:$0xff]  }
  0x41   :  { %803 = vmatpush3.bf16.msra.mxu0 %v928_v2  ;;  %v941_v36 = vld [vmem:[#allocation3 + $0x38] sm:$0xff]   ;;  %v386_v37 = vld [vmem:[#allocation8 + $0x70] sm:$0xff]  ;;  %v670_v56 = vld [vmem:[%s1139_s3] ss:$0 sm:$0xff]  ;;  %s1043_s3 = smov [#allocation9]  }
  0x42   :  { %804 = vmatprep.subr.bf16.mxu0 %v929_v3  ;;  %893 = vmatpush3.bf16.msra.mxu1 %v890_v12  ;;  %v387_v38 = vld [vmem:[#allocation8 + $0x78] sm:$0xff]  ;;  %s641_s30 = sshll.u32 %s1043_s3, 4  ;;  %s642_s30 = int_to_ptr.vmem [resolvable:$true] %s641_s30 }
  0x43   :  { %895 = vmatprep.subr.bf16.mxu1 %v894_v16  ;;  %v914_v39 = vpack.c.bf16 %v387_v38, %v386_v37  ;;  %s1008_s5 = scalar_lea.vmem %s642_s30, 1024  ;;  %p1013_p11 = scmp.lt.s32.totalorder %s642_s30, %s642_s30 }
  0x44   :  { %p1009_p10 = scmp.ne.s32.totalorder %s642_s30, %s1008_s5  ;;  %p1014_p12 = scmp.lt.s32.totalorder %s1008_s5, %s1008_s5 }
  0x45   :  { %805 = vmatpush3.bf16.msra.mxu0 %v929_v3 }
  0x46   :  { %806 = vmatprep.subr.bf16.mxu0 %v930_v5  ;;  %897 = vmatpush3.bf16.msra.mxu1 %v894_v16  ;;  %p1015_p13 = por %p1014_p12, %p1013_p11 }
  0x47   :  { %899 = vmatprep.subr.bf16.mxu1 %v898_v20 }
  0x48   :  { %p1016_p0 = pnand %p1015_p13, %p1009_p10 }
  0x49   :  { %807 = vmatpush3.bf16.msra.mxu0 %v930_v5 }
  0x4a   :  { %808 = vmatprep.subr.bf16.mxu0 %v931_v6  ;;  %901 = vmatpush3.bf16.msra.mxu1 %v898_v20 }
  0x4b   :  { %903 = vmatprep.subr.bf16.mxu1 %v902_v23 }
  0x4d   :  { %809 = vmatpush3.bf16.msra.mxu0 %v931_v6 }
  0x4e   :  { %810 = vmatprep.subr.bf16.mxu0 %v932_v15  ;;  %905 = vmatpush3.bf16.msra.mxu1 %v902_v23 }
  0x4f   :  { %907 = vmatprep.subr.bf16.mxu1 %v906_v28 }
  0x51   :  { %811 = vmatpush3.bf16.msra.mxu0 %v932_v15 }
  0x52   :  { %812 = vmatprep.subr.bf16.mxu0 %v933_v19  ;;  %909 = vmatpush3.bf16.msra.mxu1 %v906_v28 }
  0x53   :  { %911 = vmatprep.subr.bf16.mxu1 %v910_v31 }
  0x55   :  { %813 = vmatpush3.bf16.msra.mxu0 %v933_v19 }
  0x56   :  { %913 = vmatpush3.bf16.msra.mxu1 %v910_v31 }
  0x57   :  { %915 = vmatprep.subr.bf16.mxu1 %v914_v39 }
  0x58   :  { %815 = vmatmul.mubr.bf16.vlgmr.msra.gmra.mrb[0].mxu0 %v935_v24 }
  0x59   :  { %818 = vmatprep.mubr.bf16.mxu0 %v936_v27 }
  0x5a   :  { %917 = vmatpush3.bf16.msra.mxu1 %v914_v39 }
  0x60   :  { %819 = vmatmul.mubr.bf16.gmra.mrb[4].mxu0 %v937_v32 }
  0x61   :  { %822 = vmatprep.mubr.bf16.mxu0 %v938_v33 }
  0x68   :  { %823 = vmatmul.mubr.bf16.gmra.mrb[8].mxu0 %v939_v34 }
  0x69   :  { %826 = vmatprep.mubr.bf16.mxu0 %v940_v35 }
  0x70   :  { %827 = vmatmul.mubr.bf16.gmra.mrb[12].mxu0 %v941_v36 }
 0x12b   :  { %v816_v40 = vpop.f32.mrb[0].mxu0 }
 0x12c   :  { %v258_v41 = vpop.f32.mrb[1].mxu0 }
 0x12d   :  { %v817_v42 = vpop.f32.mrb[2].mxu0  ;;  %862 = vmatprep.mubr.f32.mxu1 %v258_v41 }
 0x12e   :  { %v261_v43 = vpop.f32.mrb[3].mxu0 }
 0x12f   :  { %863 = vmatmul.mubr.f32.vlgmr.msra.gmra.mrb[0].mxu1 %v261_v43 }
 0x130   :  { %865 = vmatprep.mubr.f32.mxu1 %v816_v40 }
 0x133   :  { %v820_v44 = vpop.f32.mrb[4].mxu0  ;;  %866 = vmatmul.mubr.f32.gmra.mrb[2].mxu1 %v817_v42 }
 0x134   :  { %v274_v45 = vpop.f32.mrb[5].mxu0 }
 0x135   :  { %v821_v46 = vpop.f32.mrb[6].mxu0  ;;  %868 = vmatprep.mubr.f32.mxu1 %v274_v45 }
 0x136   :  { %v277_v47 = vpop.f32.mrb[7].mxu0 }
 0x137   :  { %869 = vmatmul.mubr.f32.gmra.mrb[4].mxu1 %v277_v47 }
 0x138   :  { %871 = vmatprep.mubr.f32.mxu1 %v820_v44 }
 0x13b   :  { %v824_v48 = vpop.f32.mrb[8].mxu0  ;;  %872 = vmatmul.mubr.f32.gmra.mrb[6].mxu1 %v821_v46 }
 0x13c   :  { %v290_v49 = vpop.f32.mrb[9].mxu0 }
 0x13d   :  { %v825_v50 = vpop.f32.mrb[10].mxu0  ;;  %874 = vmatprep.mubr.f32.mxu1 %v290_v49 }
 0x13e   :  { %v293_v51 = vpop.f32.mrb[11].mxu0 }
 0x13f   :  { %875 = vmatmul.mubr.f32.gmra.mrb[8].mxu1 %v293_v51 }
 0x140   :  { %877 = vmatprep.mubr.f32.mxu1 %v824_v48 }
 0x143   :  { %v828_v52 = vpop.f32.mrb[12].mxu0  ;;  %878 = vmatmul.mubr.f32.gmra.mrb[10].mxu1 %v825_v50 }
 0x144   :  { %v306_v53 = vpop.f32.mrb[13].mxu0 }
 0x145   :  { %v829_v54 = vpop.f32.mrb[14].mxu0  ;;  %880 = vmatprep.mubr.f32.mxu1 %v306_v53 }
 0x146   :  { %v309_v55 = vpop.f32.mrb[15].mxu0 }
 0x147   :  { %881 = vmatmul.mubr.f32.gmra.mrb[12].mxu1 %v309_v55 }
 0x148   :  { %883 = vmatprep.mubr.f32.mxu1 %v828_v52 }
 0x14b   :  { %884 = vmatmul.mubr.f32.gmra.mrb[14].mxu1 %v829_v54 }
 0x202   :  { %v864_v57 = vpop.f32.mrb[0].mxu1 }
 0x203   :  { %v467_v58 = vadd.f32 %v864_v57, %v670_v56  ;;  %v461_v59 = vpop.f32.mrb[1].mxu1 }
 0x204   :  { %v462_v60 = vadd.f32 %v670_v56, %v461_v59 }
 0x205   :  { %v541_v61 = vmax.f32 %v467_v58, 0.0 }
 0x206   :  { %v540_v62 = vmax.f32 %v462_v60, 0.0  ;;  %v867_v63 = vpop.f32.mrb[2].mxu1 }
 0x207   :  { %v477_v0 = vadd.f32 %v867_v63, %v670_v56  ;;  %v471_v1 = vpop.f32.mrb[3].mxu1 }
 0x208   :  { %v706_v2 = vpack.c.bf16 %v541_v61, %v540_v62  ;;  %v472_v3 = vadd.f32 %v670_v56, %v471_v1 }
 0x209   :  { %v543_v4 = vmax.f32 %v477_v0, 0.0 }
 0x20a   :  { %707 = vst [vmem:[#allocation9] sm:$0xff] %v706_v2   ;;  %v542_v5 = vmax.f32 %v472_v3, 0.0  ;;  %v870_v6 = vpop.f32.mrb[4].mxu1 }
 0x20b   :  { %v487_v7 = vadd.f32 %v870_v6, %v670_v56  ;;  %v481_v8 = vpop.f32.mrb[5].mxu1 }
 0x20c   :  { %v711_v9 = vpack.c.bf16 %v543_v4, %v542_v5  ;;  %v482_v10 = vadd.f32 %v670_v56, %v481_v8 }
 0x20d   :  { %v545_v11 = vmax.f32 %v487_v7, 0.0 }
 0x20e   :  { %743 = vst [vmem:[#allocation9 + $0x8] sm:$0xff] %v711_v9   ;;  %v544_v12 = vmax.f32 %v482_v10, 0.0  ;;  %v873_v13 = vpop.f32.mrb[6].mxu1 }
 0x20f   :  { %v497_v14 = vadd.f32 %v873_v13, %v670_v56  ;;  %v491_v15 = vpop.f32.mrb[7].mxu1 }
 0x210   :  { %v716_v16 = vpack.c.bf16 %v545_v11, %v544_v12  ;;  %v492_v17 = vadd.f32 %v670_v56, %v491_v15 }
 0x211   :  { %v547_v18 = vmax.f32 %v497_v14, 0.0 }
 0x212   :  { %744 = vst [vmem:[#allocation9 + $0x10] sm:$0xff] %v716_v16   ;;  %v546_v19 = vmax.f32 %v492_v17, 0.0  ;;  %v876_v20 = vpop.f32.mrb[8].mxu1 }
 0x213   :  { %v507_v21 = vadd.f32 %v876_v20, %v670_v56  ;;  %v501_v22 = vpop.f32.mrb[9].mxu1 }
 0x214   :  { %v721_v23 = vpack.c.bf16 %v547_v18, %v546_v19  ;;  %v502_v24 = vadd.f32 %v670_v56, %v501_v22 }
 0x215   :  { %v549_v25 = vmax.f32 %v507_v21, 0.0 }
 0x216   :  { %745 = vst [vmem:[#allocation9 + $0x18] sm:$0xff] %v721_v23   ;;  %v548_v26 = vmax.f32 %v502_v24, 0.0  ;;  %v879_v27 = vpop.f32.mrb[10].mxu1 }
 0x217   :  { %v517_v28 = vadd.f32 %v879_v27, %v670_v56  ;;  %v511_v29 = vpop.f32.mrb[11].mxu1 }
 0x218   :  { %v726_v30 = vpack.c.bf16 %v549_v25, %v548_v26  ;;  %v512_v31 = vadd.f32 %v670_v56, %v511_v29 }
 0x219   :  { %v551_v32 = vmax.f32 %v517_v28, 0.0 }
 0x21a   :  { %746 = vst [vmem:[#allocation9 + $0x20] sm:$0xff] %v726_v30   ;;  %v550_v33 = vmax.f32 %v512_v31, 0.0  ;;  %v882_v34 = vpop.f32.mrb[12].mxu1 }
 0x21b   :  { %v527_v35 = vadd.f32 %v882_v34, %v670_v56  ;;  %v521_v36 = vpop.f32.mrb[13].mxu1 }
 0x21c   :  { %v731_v37 = vpack.c.bf16 %v551_v32, %v550_v33  ;;  %v522_v38 = vadd.f32 %v670_v56, %v521_v36 }
 0x21d   :  { %v553_v39 = vmax.f32 %v527_v35, 0.0 }
 0x21e   :  { %747 = vst [vmem:[#allocation9 + $0x28] sm:$0xff] %v731_v37   ;;  %v552_v40 = vmax.f32 %v522_v38, 0.0  ;;  %v885_v41 = vpop.f32.mrb[14].mxu1 }
 0x21f   :  { %v537_v42 = vadd.f32 %v885_v41, %v670_v56  ;;  %v531_v43 = vpop.f32.mrb[15].mxu1 }
 0x220   :  { %v736_v44 = vpack.c.bf16 %v553_v39, %v552_v40  ;;  %v532_v45 = vadd.f32 %v670_v56, %v531_v43 }
 0x221   :  { %v555_v46 = vmax.f32 %v537_v42, 0.0 }
 0x222   :  { %748 = vst [vmem:[#allocation9 + $0x30] sm:$0xff] %v736_v44   ;;  %v554_v47 = vmax.f32 %v532_v45, 0.0 }
 0x224   :  { %v741_v48 = vpack.c.bf16 %v555_v46, %v554_v47 }
 0x226   :  { %749 = vst [vmem:[#allocation9 + $0x38] sm:$0xff] %v741_v48  }
 0x227   :  { %1019 = shalt.err (!%p1016_p0)
}
 0x228   :  { %s1020_s8 = scalar_lea.hbm %s1140_s4, 1024 }
 0x229   :  { %p1021_p1 = scmp.ne.s32.totalorder %s1140_s4, %s1020_s8  ;;  %p1024_p2 = scmp.lt.u32.totalorder %s1020_s8, %s1140_s4 }
 0x22b   :  { %p1026_p3 = pnand %p1024_p2, %p1021_p1 }
 0x22d   :  { %1029 = shalt.err (!%p1026_p3)
}
 0x22e   :  { %647 = dma.vmem_to_hbm [thread:$0]  %s642_s30, 1024, %s1140_s4, [#allocation5], %s1038_s27, %s1038_s27, %s1039_s28  }
 0x22f   :  { %1034 = dma.done.wait [#allocation5], 1024  }
 0x230   :  { %1035 = vsyncadd [#allocation5], 4294966272 }
 0x231   :  { %651 = vsyncpa [#allocation4], 1 }
 0x232   :  { %652 = vsyncpa [#allocation7], 1 }
 0x233   :  { %653 = vsyncpa [#allocation5], 1 }

</bundles_post_ra>
